<compile_context>
chip_gen: v6e
topology: v6e:2x2x1
jax: 0.10.0
libtpu: 0.0.40
codegen_flags: <defaults>
</compile_context>

<pallas_src>
import functools
import math

import jax
import jax.numpy as jnp
from jax.experimental import pallas as pl
from jax.experimental.pallas import tpu as pltpu

_INV_SQRT2 = 1.0 / math.sqrt(2.0)


def _round_up(x, m):
    return ((x + m - 1) // m) * m


def _gelu(x, approximate):
    if approximate:
        # tanh form -> EUP (separate VLIW slot); ~1e-3 max abs delta vs the
        # exact-erf nn.GELU() default.
        return jax.nn.gelu(x, approximate=True)
    return 0.5 * x * (1.0 + jax.lax.erf(x * _INV_SQRT2))


# ---------------------------------------------------------------------------
# Kernels
# ---------------------------------------------------------------------------
def _mlp_kernel_resident(x_ref, w1_ref, b1_ref, w2_ref, b2_ref, o_ref, *,
                         approximate):
    """Full hidden dim resident in VMEM: single pass, no accumulator scratch."""
    h = jnp.dot(x_ref[...], w1_ref[...], preferred_element_type=jnp.float32)
    h = _gelu(h + b1_ref[...], approximate)
    # TODO(synk): dropout (train mode) omitted — identity, matching eval().
    y = jnp.dot(h.astype(w2_ref.dtype), w2_ref[...],
                preferred_element_type=jnp.float32)
    o_ref[...] = _gelu(y + b2_ref[...], approximate).astype(o_ref.dtype)


def _mlp_kernel_chunked(x_ref, w1_ref, b1_ref, w2_ref, b2_ref, o_ref, acc_ref,
                        *, approximate):
    """Hidden dim streamed in tile_f chunks; f32 accumulator over the f axis."""
    f = pl.program_id(1)

    @pl.when(f == 0)
    def _():
        # Seed the accumulator with the second bias -> no epilogue add needed.
        acc_ref[...] = jnp.broadcast_to(b2_ref[...], acc_ref.shape)

    # First matmul + bias + GELU on this F-chunk (GELU is elementwise over F,
    # so chunking F commutes with it).
    h = jnp.dot(x_ref[...], w1_ref[...], preferred_element_type=jnp.float32)
    h = _gelu(h + b1_ref[...], approximate)
    # TODO(synk): dropout (train mode) omitted — identity, matching eval().
    acc_ref[...] += jnp.dot(h.astype(w2_ref.dtype), w2_ref[...],
                            preferred_element_type=jnp.float32)

    @pl.when(f == pl.num_programs(1) - 1)
    def _():
        o_ref[...] = _gelu(acc_ref[...], approximate).astype(o_ref.dtype)


# ---------------------------------------------------------------------------
# Wrapper
# ---------------------------------------------------------------------------
def transformer_mlp(x, w1, b1, w2, b2, *, tile_m=512, tile_f=None,
                    gelu_approx=True, mxu_dtype=None):
    """x: (batch, seq, dim) -> (batch, seq, dim).

    w1: (dim, fc_dims), b1: (fc_dims,), w2: (fc_dims, dim), b2: (dim,)
    tile_m / tile_f are hints; they are shrunk automatically to fit the
    per-generation VMEM budget.  Set mxu_dtype=jnp.bfloat16 to run the matmuls
    in bf16 (f32 accumulation) on f32 inputs.
    """
    B, S, D = x.shape
    F = w1.shape[1]
    N = B * S

    out_dtype = x.dtype
    in_dtype = jnp.dtype(mxu_dtype) if mxu_dtype is not None else jnp.dtype(x.dtype)
    isz = in_dtype.itemsize
    osz = jnp.dtype(out_dtype).itemsize

    D_p = _round_up(D, 128)            # lane-dense last dims (unmasked vst)
    F_full = _round_up(F, 128)

    # ---- per-generation VMEM budget (per TensorCore) ------------------------
    try:
        vmem_cap = int(getattr(pltpu.get_tpu_info(), "vmem_capacity_bytes",
                               64 << 20))
    except Exception:                  # e.g. interpret mode / query unsupported
        vmem_cap = 64 << 20            # conservative: v7x per-core size
    # ~51 MiB on v7x, ~102 MiB on v5e/v6e.
    vmem_budget = max(32 << 20, min(int(vmem_cap * 0.80), 104 << 20))

    def vmem_est(tm_, tf_):
        est = (
            2 * tm_ * D_p * isz                    # x tile (double buffered)
            + 2 * tm_ * D_p * osz                  # out tile
            + 2 * (D_p * tf_ + tf_ * D_p) * isz    # W1 + W2 blocks (2 bufs each)
            + 2 * (tf_ + D_p) * 4                  # biases (f32)
            + tm_ * tf_ * 4                        # h intermediate (f32)
            + tm_ * D_p * 4                        # acc / y intermediate (f32)
        )
        return int(est * 1.15)                     # GELU temps, compiler scratch

    # ---- row tiling: big tiles cut weight re-streaming; keep the tile count
    # >= 2 and even so the "parallel" axis shards evenly across v7x's 2 TCs.
    tm = max(8, min(_round_up(tile_m, 8), _round_up(N, 8)))
    n_tiles = -(-N // tm)
    if n_tiles < 2 or (n_tiles % 2):
        target = max(2, 2 * (-(-n_tiles // 2)))    # next even count >= 2
        tm = max(8, _round_up(-(-N // target), 8))

    # ---- hidden (F) tiling: keep all of F resident when the budget allows,
    # so W1/W2 are DMA'd from HBM exactly once (constant block index).
    if tile_f is None:
        tf = F_full if vmem_est(tm, F_full) <= vmem_budget else min(512, F_full)
    else:
        tf = min(_round_up(tile_f, 128), F_full)
    while vmem_est(tm, tf) > vmem_budget and (tf > 128 or tm > 8):
        if tf > 128:
            tf = max(128, _round_up(tf // 2, 128))
        else:
            tm = max(8, _round_up(tm // 2, 8))
    resident = tf >= F_full
    F_p = F_full if resident else _round_up(F, tf)
    N_p = _round_up(N, tm)

    # ---- pad / cast operands (guarded: no-ops when already aligned) ---------
    x2 = x.reshape(N, D)
    if x2.dtype != in_dtype:
        x2 = x2.astype(in_dtype)
    if w1.dtype != in_dtype:
        w1 = w1.astype(in_dtype)
        w2 = w2.astype(in_dtype)
    if (N_p, D_p) != (N, D):
        x2 = jnp.pad(x2, ((0, N_p - N), (0, D_p - D)))
    w1p = w1 if (D_p, F_p) == (D, F) else jnp.pad(w1, ((0, D_p - D), (0, F_p - F)))
    w2p = w2 if (F_p, D_p) == (F, D) else jnp.pad(w2, ((0, F_p - F), (0, D_p - D)))
    b1p = (b1 if F_p == F else jnp.pad(b1, (0, F_p - F)))
    b2p = (b2 if D_p == D else jnp.pad(b2, (0, D_p - D)))
    b1p = b1p.astype(jnp.float32).reshape(1, F_p)    # f32 once, outside kernel
    b2p = b2p.astype(jnp.float32).reshape(1, D_p)

    vmem_limit = int(min(vmem_budget,
                         max(int(vmem_est(tm, tf) * 1.25), 32 << 20)))
    cost = pl.CostEstimate(
        flops=int(4 * N * D * F),
        transcendentals=int(N * (F + D)),
        bytes_accessed=int(x2.size * isz + N_p * D_p * osz
                           + (w1p.size + w2p.size) * isz),
    )

    if resident:
        grid = (N_p // tm,)
        in_specs = [
            pl.BlockSpec((tm, D_p), lambda i: (i, 0)),     # x rows
            pl.BlockSpec((D_p, F_p), lambda i: (0, 0)),    # W1 (fetched once)
            pl.BlockSpec((1, F_p), lambda i: (0, 0)),      # b1
            pl.BlockSpec((F_p, D_p), lambda i: (0, 0)),    # W2 (fetched once)
            pl.BlockSpec((1, D_p), lambda i: (0, 0)),      # b2
        ]
        out_specs = pl.BlockSpec((tm, D_p), lambda i: (i, 0))
        scratch = []
        dims = ("parallel",)
        kernel = functools.partial(_mlp_kernel_resident, approximate=gelu_approx)
    else:
        grid = (N_p // tm, F_p // tf)
        in_specs = [
            pl.BlockSpec((tm, D_p), lambda i, f: (i, 0)),  # x rows
            pl.BlockSpec((D_p, tf), lambda i, f: (0, f)),  # W1 chunk
            pl.BlockSpec((1, tf), lambda i, f: (0, f)),    # b1 chunk
            pl.BlockSpec((tf, D_p), lambda i, f: (f, 0)),  # W2 chunk
            pl.BlockSpec((1, D_p), lambda i, f: (0, 0)),   # b2
        ]
        out_specs = pl.BlockSpec((tm, D_p), lambda i, f: (i, 0))
        scratch = [pltpu.VMEM((tm, D_p), jnp.float32)]
        dims = ("parallel", "arbitrary")
        kernel = functools.partial(_mlp_kernel_chunked, approximate=gelu_approx)

    out = pl.pallas_call(
        kernel,
        out_shape=jax.ShapeDtypeStruct((N_p, D_p), out_dtype),
        grid_spec=pltpu.PrefetchScalarGridSpec(
            num_scalar_prefetch=0,
            grid=grid,
            in_specs=in_specs,
            out_specs=out_specs,
            scratch_shapes=scratch,
        ),
        compiler_params=pltpu.CompilerParams(
            dimension_semantics=dims,
            vmem_limit_bytes=vmem_limit,
        ),
        cost_estimate=cost,
    )(x2, w1p, b1p, w2p, b2p)

    return out[:N, :D].reshape(B, S, D)


# ---------------------------------------------------------------------------
# Reference + init helpers
# ---------------------------------------------------------------------------
def init_params(key, dim, fc_dims, dtype=jnp.float32):
    """Deterministic init mimicking nn.Linear's uniform(-1/sqrt(in), 1/sqrt(in))."""
    k1, k2, k3, k4 = jax.random.split(key, 4)
    bound1 = 1.0 / math.sqrt(dim)
    bound2 = 1.0 / math.sqrt(fc_dims)
    # stored as (in, out) == PyTorch weight.T
    w1 = jax.random.uniform(k1, (dim, fc_dims), dtype, -bound1, bound1)
    b1 = jax.random.uniform(k2, (fc_dims,), dtype, -bound1, bound1)
    w2 = jax.random.uniform(k3, (fc_dims, dim), dtype, -bound2, bound2)
    b2 = jax.random.uniform(k4, (dim,), dtype, -bound2, bound2)
    return w1, b1, w2, b2


def reference_mlp(x, w1, b1, w2, b2, approximate=True):
    h = _gelu(x @ w1 + b1, approximate)
    y = _gelu(h @ w2 + b2, approximate)
    return y


if __name__ == "__main__":
    # --- small demo shapes consistent with the module (batch=2, seq=8) ------
    dim, fc_dims = 32, 64
    batch, seq = 2, 8

    key = jax.random.PRNGKey(0)
    kx, kp = jax.random.split(key)
    x = jax.random.normal(kx, (batch, seq, dim), jnp.float32)
    w1, b1, w2, b2 = init_params(kp, dim, fc_dims)

    out = jax.block_until_ready(transformer_mlp(x, w1, b1, w2, b2))
    assert out.shape == x.shape
    ref = reference_mlp(x, w1, b1, w2, b2, approximate=True)
    assert jnp.allclose(out, ref, atol=2e-5, rtol=2e-5)
    # Delta vs nn.GELU's exact-erf default stays at the ~1e-3 level.
    ref_exact = reference_mlp(x, w1, b1, w2, b2, approximate=False)
    assert jnp.allclose(out, ref_exact, atol=5e-3, rtol=5e-3)

    # --- larger shapes, f32, forced F-chunked accumulator path --------------
    dim2, fc2 = 256, 1024
    batch2, seq2 = 2, 384            # 768 rows -> 2 row tiles of 512/256
    kx2, kp2 = jax.random.split(jax.random.PRNGKey(1))
    x2 = jax.random.normal(kx2, (batch2, seq2, dim2), jnp.float32)
    p2 = init_params(kp2, dim2, fc2)
    ref2 = reference_mlp(x2, *p2, approximate=True)

    out2 = jax.block_until_ready(transformer_mlp(x2, *p2, tile_f=256))
    assert jnp.allclose(out2, ref2, atol=5e-4, rtol=5e-4)

    # --- same shapes, auto (weights-resident) tiling + bf16 MXU path --------
    out3 = jax.block_until_ready(
        transformer_mlp(x2, *p2, mxu_dtype=jnp.bfloat16))
    assert jnp.allclose(out3, ref2, atol=3e-2, rtol=3e-2)

    print("KERNEL_OK")
</pallas_src>

<mosaic_0001>
module attributes {stable_mosaic.version = 11 : i64} {
  func.func @_mlp_kernel_resident(%arg0: i32, %arg1: memref<8x128xf32, #tpu.memory_space<vmem>>, %arg2: memref<128x128xf32, #tpu.memory_space<vmem>>, %arg3: memref<1x128xf32, #tpu.memory_space<vmem>>, %arg4: memref<128x128xf32, #tpu.memory_space<vmem>>, %arg5: memref<1x128xf32, #tpu.memory_space<vmem>>, %arg6: memref<8x128xf32, #tpu.memory_space<vmem>>) attributes {dimension_semantics = [#tpu.dimension_semantics<parallel>], iteration_bounds = array<i64: 2>, scalar_prefetch = 0 : i64, scratch_operands = 0 : i64, tpu.core_type = #tpu.core_type<tc>, window_params = [{transform_indices = @transform_0, window_bounds = array<i64: 8, 128>}, {pipeline_mode = #tpu.pipeline_mode<synchronous>, transform_indices = @transform_1, window_bounds = array<i64: 128, 128>}, {pipeline_mode = #tpu.pipeline_mode<synchronous>, transform_indices = @transform_2, window_bounds = array<i64: 1, 128>}, {pipeline_mode = #tpu.pipeline_mode<synchronous>, transform_indices = @transform_3, window_bounds = array<i64: 128, 128>}, {pipeline_mode = #tpu.pipeline_mode<synchronous>, transform_indices = @transform_4, window_bounds = array<i64: 1, 128>}, {transform_indices = @transform_5, window_bounds = array<i64: 8, 128>}]} {
    %c0 = arith.constant 0 : index
    %c0_0 = arith.constant 0 : index
    %0 = vector.load %arg1[%c0, %c0_0] : memref<8x128xf32, #tpu.memory_space<vmem>>, vector<8x128xf32>
    %c0_1 = arith.constant 0 : index
    %c0_2 = arith.constant 0 : index
    %1 = vector.load %arg2[%c0_1, %c0_2] : memref<128x128xf32, #tpu.memory_space<vmem>>, vector<128x128xf32>
    %cst = arith.constant dense<0.000000e+00> : vector<8x128xf32>
    %2 = tpu.matmul %0, %1, %cst {dimension_numbers = #tpu.dot_dimension_numbers<[1], [0], [0], [1], [0, 0, 1, 1], [], []>} : vector<8x128xf32>, vector<128x128xf32>, vector<8x128xf32> -> vector<8x128xf32>
    %c0_3 = arith.constant 0 : index
    %c0_4 = arith.constant 0 : index
    %3 = vector.load %arg3[%c0_3, %c0_4] : memref<1x128xf32, #tpu.memory_space<vmem>>, vector<1x128xf32>
    %4 = vector.broadcast %3 : vector<1x128xf32> to vector<8x128xf32>
    %5 = arith.addf %2, %4 : vector<8x128xf32>
    %6 = arith.mulf %5, %5 : vector<8x128xf32>
    %7 = arith.mulf %5, %6 : vector<8x128xf32>
    %cst_5 = arith.constant 4.471500e-02 : f32
    %8 = vector.broadcast %cst_5 : f32 to vector<8x128xf32>
    %9 = arith.mulf %8, %7 : vector<8x128xf32>
    %10 = arith.addf %5, %9 : vector<8x128xf32>
    %cst_6 = arith.constant 0.797884583 : f32
    %11 = vector.broadcast %cst_6 : f32 to vector<8x128xf32>
    %12 = arith.mulf %11, %10 : vector<8x128xf32>
    %13 = math.tanh %12 : vector<8x128xf32>
    %cst_7 = arith.constant 1.000000e+00 : f32
    %14 = vector.broadcast %cst_7 : f32 to vector<8x128xf32>
    %15 = arith.addf %14, %13 : vector<8x128xf32>
    %cst_8 = arith.constant 5.000000e-01 : f32
    %16 = vector.broadcast %cst_8 : f32 to vector<8x128xf32>
    %17 = arith.mulf %16, %15 : vector<8x128xf32>
    %18 = arith.mulf %5, %17 : vector<8x128xf32>
    %c0_9 = arith.constant 0 : index
    %c0_10 = arith.constant 0 : index
    %19 = vector.load %arg4[%c0_9, %c0_10] : memref<128x128xf32, #tpu.memory_space<vmem>>, vector<128x128xf32>
    %cst_11 = arith.constant dense<0.000000e+00> : vector<8x128xf32>
    %20 = tpu.matmul %18, %19, %cst_11 {dimension_numbers = #tpu.dot_dimension_numbers<[1], [0], [0], [1], [0, 0, 1, 1], [], []>} : vector<8x128xf32>, vector<128x128xf32>, vector<8x128xf32> -> vector<8x128xf32>
    %c0_12 = arith.constant 0 : index
    %c0_13 = arith.constant 0 : index
    %21 = vector.load %arg5[%c0_12, %c0_13] : memref<1x128xf32, #tpu.memory_space<vmem>>, vector<1x128xf32>
    %22 = vector.broadcast %21 : vector<1x128xf32> to vector<8x128xf32>
    %23 = arith.addf %20, %22 : vector<8x128xf32>
    %24 = arith.mulf %23, %23 : vector<8x128xf32>
    %25 = arith.mulf %23, %24 : vector<8x128xf32>
    %cst_14 = arith.constant 4.471500e-02 : f32
    %26 = vector.broadcast %cst_14 : f32 to vector<8x128xf32>
    %27 = arith.mulf %26, %25 : vector<8x128xf32>
    %28 = arith.addf %23, %27 : vector<8x128xf32>
    %cst_15 = arith.constant 0.797884583 : f32
    %29 = vector.broadcast %cst_15 : f32 to vector<8x128xf32>
    %30 = arith.mulf %29, %28 : vector<8x128xf32>
    %31 = math.tanh %30 : vector<8x128xf32>
    %cst_16 = arith.constant 1.000000e+00 : f32
    %32 = vector.broadcast %cst_16 : f32 to vector<8x128xf32>
    %33 = arith.addf %32, %31 : vector<8x128xf32>
    %cst_17 = arith.constant 5.000000e-01 : f32
    %34 = vector.broadcast %cst_17 : f32 to vector<8x128xf32>
    %35 = arith.mulf %34, %33 : vector<8x128xf32>
    %36 = arith.mulf %23, %35 : vector<8x128xf32>
    %c0_18 = arith.constant 0 : index
    %c0_19 = arith.constant 0 : index
    %37 = vector.load %arg6[%c0_18, %c0_19] : memref<8x128xf32, #tpu.memory_space<vmem>>, vector<8x128xf32>
    tpu.vector_store %arg6[%c0_18, %c0_19], %36 {strides = array<i32>} : memref<8x128xf32, #tpu.memory_space<vmem>>, vector<8x128xf32>,
    return
  }
  func.func @transform_0(%arg0: i32) -> (i32, i32) {
    %c0_i32 = arith.constant 0 : i32
    %c0_i32_0 = arith.constant 0 : i32
    return %arg0, %c0_i32 : i32, i32
  }
  func.func @transform_1(%arg0: i32) -> (i32, i32) {
    %c0_i32 = arith.constant 0 : i32
    %c0_i32_0 = arith.constant 0 : i32
    %c0_i32_1 = arith.constant 0 : i32
    return %c0_i32, %c0_i32_0 : i32, i32
  }
  func.func @transform_2(%arg0: i32) -> (i32, i32) {
    %c0_i32 = arith.constant 0 : i32
    %c0_i32_0 = arith.constant 0 : i32
    %c0_i32_1 = arith.constant 0 : i32
    return %c0_i32, %c0_i32_0 : i32, i32
  }
  func.func @transform_3(%arg0: i32) -> (i32, i32) {
    %c0_i32 = arith.constant 0 : i32
    %c0_i32_0 = arith.constant 0 : i32
    %c0_i32_1 = arith.constant 0 : i32
    return %c0_i32, %c0_i32_0 : i32, i32
  }
  func.func @transform_4(%arg0: i32) -> (i32, i32) {
    %c0_i32 = arith.constant 0 : i32
    %c0_i32_0 = arith.constant 0 : i32
    %c0_i32_1 = arith.constant 0 : i32
    return %c0_i32, %c0_i32_0 : i32, i32
  }
  func.func @transform_5(%arg0: i32) -> (i32, i32) {
    %c0_i32 = arith.constant 0 : i32
    %c0_i32_0 = arith.constant 0 : i32
    return %arg0, %c0_i32 : i32, i32
  }
}

</mosaic_0001>

<bundles_post_ra>
// kernel: tpu_custom_call.1
= control target key start
LH: loop header
LB: loop body
LE: loop exit
PB: predicated region body
PF: predicated region fallthrough
CT: control target
= control target key end

     0   :  { %10 = vsyncpa [#allocation3], 0  ;;  %s1175_s0 = inlined_call_operand.hbm [shape: f32[16,128], index: 0, kind: input, shape index: {}]   ;;  %s1176_s1 = inlined_call_operand.hbm [shape: f32[128,128], index: 1, kind: input, shape index: {}]   ;;  %s1177_s2 = inlined_call_operand.vmem [shape: f32[1,128], index: 2, kind: input, shape index: {}]   ;;  %s1178_s3 = inlined_call_operand.hbm [shape: f32[128,128], index: 3, kind: input, shape index: {}]   ;;  %s1179_s4 = inlined_call_operand.vmem [shape: f32[1,128], index: 4, kind: input, shape index: {}]   ;;  %s1180_s5 = inlined_call_operand.hbm [shape: f32[16,128], index: 5, kind: output, shape index: {}]  }
   0x1   :  { %12 = vsyncpa [#allocation3 + $0x1], 0 }
   0x2   :  { %13 = vsyncpa [#allocation6], 0 }
   0x3   :  { %14 = vsyncpa [#allocation4], 0 }
   0x4   :  { %16 = vsyncpa [#allocation4 + $0x1], 0  ;;  %s963_s18 = smov 0   ;;  %s965_s19 = smov 0  }
   0x5   :  { %s967_s20 = smov 0   ;;  %s969_s21 = smov 0  }
   0x6 LB: > { %s984_s22 = sadd.s32 4294967295, %s923_s21   ;;  %s578_s23 = sadd.s32 4294967294, %s923_s21   ;;  %s923_s21 = sphi %s969_s21, %s1202_s21   ;;  %s919_s20 = sphi %s967_s20, %s1201_s20   ;;  %s915_s19 = sphi %s965_s19, %s1200_s19   ;;  %s911_s18 = sphi %s963_s18, %s1199_s18  }
   0x7   : > { %p42_p0 = scmp.ne.s32.totalorder %s915_s19, %s911_s18  ;;  %p1181_p1 = scmp.eq.s32.totalorder %s984_s22, 0 }
   0x8   : > { %p156_p3 = scmp.eq.s32.totalorder %s578_s23, 1  ;;  %p579_p5 = scmp.ge.s32.totalorder %s923_s21, 1 }
   0x9   : > { %p993_p4 = por %p1181_p1, %p42_p0  ;;  %p163_p7 = scmp.lt.s32.totalorder %s923_s21, 3 }
   0xa   : > { %p998_p6 = por %p156_p3, %p42_p0  ;;  %s925_s27 = smov [#allocation5]  }
   0xb   : > { %s1185_s24 = scalar_select %p993_p4, 1, 0 }
   0xc   : > { %s1186_s25 = scalar_select %p998_p6, 1, 0 }
   0xd   : > { %p1003_p8 = pnand %p579_p5, %p163_p7  ;;  %s175_s28 = sshll.u32 %s925_s27, 4  ;;  %s176_s28 = int_to_ptr.vmem [resolvable:$true] %s175_s28 }
   0xe   : > { %s926_s30 = smov [#allocation7]   ;;  %s786_s7 = scalar_lea.vmem %s176_s28, 2048 }
   0xf   : > { %s1187_s26 = scalar_select %p1003_p8, 1, 0 }
  0x10   : > { %p712_p9 = pneg %p1003_p8  ;;  %s191_s6 = sshll.u32 %s926_s30, 4  ;;  %s192_s6 = int_to_ptr.vmem [resolvable:$true] %s191_s6 }
  0x11   : > { %p787_p13 = scmp.ne.s32.totalorder %s176_s28, %s786_s7  ;;  %p794_p5 = scmp.lt.s32.totalorder %s176_s28, %s176_s28 }
  0x12   : > { %p1012_p11 = pnand %p712_p9, %p1181_p1  ;;  %p795_p7 = scmp.lt.s32.totalorder %s786_s7, %s786_s7 }
  0x14   : > { %p777_p12 = pneg %p1012_p11  ;;  %p796_p10 = por %p795_p7, %p794_p5 }
  0x16   : > { %p789_p0 = pnand %p787_p13, %p777_p12 }
  0x18   : > { %p790_p3 = pneg %p789_p0 }
  0x1a   : > { %p797_p9 = pnand %p796_p10, %p790_p3 }
  0x1c   : > { %800 = shalt.err (!%p797_p9)
}
  0x1d   : > { %s927_s8 = smov 128   ;;  %s928_s9 = smov 8  }
  0x1e   : > { %715 = dma.hbm_to_vmem [thread:$0]  (!%p1012_p11), %s1176_s1, 2048, %s176_s28, [#allocation6], %s927_s8, %s927_s8, %s928_s9  }
  0x1f   : > { %s812_s12 = scalar_lea.vmem %s192_s6, 2048  ;;  %p820_p2 = scmp.lt.s32.totalorder %s192_s6, %s192_s6 }
  0x20   : > { %p813_p1 = scmp.ne.s32.totalorder %s192_s6, %s812_s12  ;;  %p821_p6 = scmp.lt.s32.totalorder %s812_s12, %s812_s12 }
  0x22   : > { %p815_p13 = pnand %p813_p1, %p777_p12  ;;  %p822_p5 = por %p821_p6, %p820_p2 }
  0x24   : > { %p816_p0 = pneg %p815_p13 }
  0x26   : > { %p823_p10 = pnand %p822_p5, %p816_p0 }
  0x28   : > { %826 = shalt.err (!%p823_p10)
}
  0x29   : > { %718 = dma.hbm_to_vmem [thread:$0]  (!%p1012_p11), %s1178_s3, 2048, %s192_s6, [#allocation6], %s927_s8, %s927_s8, %s928_s9  }
  0x2a   : > { %s1035_s15 = sadd.s32 1, %s923_s21   ;;  %s29_s16 = sadd.s32 1, %s919_s20 }
  0x2b   : > { %s26_s17 = ssub.s32 %s923_s21, %s1035_s15  ;;  %p36_p1 = scmp.ne.s32.totalorder %s919_s20, %s915_s19 }
  0x2c   : > { %p27_p2 = scmp.eq.s32.totalorder %s26_s17, 0  ;;  %p37_p6 = scmp.eq.s32.totalorder %s923_s21, 0 }
  0x2d   : > { %p1189_p12 = scmp.eq.s32.totalorder %s984_s22, 1  ;;  %p729_p7 = scmp.lt.s32.totalorder %s923_s21, 2 }
  0x2e   : > { %s1051_s27 = scalar_select %p27_p2, %s919_s20, %s29_s16  }
  0x2f   : > { %p1045_p3 = por %p1189_p12, %p36_p1  ;;  %p38_p9 = por %p37_p6, %p36_p1 }
  0x30   : > { %s208_s28 = sand.u32 1, %s919_s20   ;;  %s584_s30 = sshll.u32 %s923_s21, 7 }
  0x31   : > { %s1190_s23 = scalar_select %p1045_p3, 1, 0 }
  0x32   : > { %s583_s29 = sshll.u32 %s208_s28, 3  ;;  %s1058_s8 = scalar_lea.hbm %s1175_s0, %s584_s30 }
  0x33   : > { %s212_s9 = scalar_lea.vmem [#allocation2], %s583_s29  ;;  %p1060_p11 = pnand %p729_p7, %p38_p9 }
  0x34   : > { %s219_s10 = sshll.u32 %s212_s9, 4  ;;  %s209_s12 = scalar_lea.sflag [#allocation3], %s208_s28  ;;  %s220_s10 = int_to_ptr.vmem [resolvable:$true] %s219_s10 }
  0x35   : > { %s827_s13 = scalar_lea.hbm %s1058_s8, 128  ;;  %p829_p0 = pneg %p1060_p11 }
  0x36   : > { %p828_p13 = scmp.ne.s32.totalorder %s1058_s8, %s827_s13  ;;  %s832_s17 = scalar_lea.hbm %s1175_s0, 256 }
  0x37   : > { %p833_p1 = scmp.lt.s32.totalorder %s1058_s8, %s1175_s0  ;;  %p834_p2 = scmp.lt.s32.totalorder %s832_s17, %s827_s13 }
  0x38   : > { %p830_p5 = pnand %p829_p0, %p828_p13 }
  0x39   : > { %p835_p6 = por %p834_p2, %p833_p1 }
  0x3a   : > { %p831_p10 = pneg %p830_p5 }
  0x3c   : > { %p836_p12 = pnand %p835_p6, %p831_p10 }
  0x3e   : > { %839 = shalt.err (!%p836_p12)
}
  0x3f   : > { %s840_s6 = scalar_lea.vmem %s220_s10, 128  ;;  %s929_s28 = smov [#allocation2]  }
  0x40   : > { %p841_p7 = scmp.ne.s32.totalorder %s220_s10, %s840_s6  ;;  %s845_s7 = sshll.u32 %s929_s28, 4  ;;  %s846_s7 = int_to_ptr.vmem [resolvable:$false] %s845_s7 }
  0x41   : > { %s847_s9 = scalar_lea.vmem %s846_s7, 256  ;;  %p848_p13 = scmp.lt.s32.totalorder %s220_s10, %s846_s7 }
  0x42   : > { %p843_p9 = pnand %p841_p7, %p829_p0  ;;  %p849_p5 = scmp.lt.s32.totalorder %s847_s9, %s840_s6 }
  0x44   : > { %p844_p3 = pneg %p843_p9  ;;  %p850_p4 = por %p849_p5, %p848_p13 }
  0x46   : > { %p851_p8 = pnand %p850_p4, %p844_p3 }
  0x48   : > { %854 = shalt.err (!%p851_p8)
}
  0x49   : > { %722 = dma.hbm_to_vmem [thread:$0]  (!%p1060_p11), %s1058_s8, 128, %s220_s10, %s209_s12  }
  0x4a   : > { %p1192_p10 = scmp.ne.s32.totalorder %s1187_s26, 0 }
  0x4b   : > { %s1081_s13 = sand.u32 (!%p1192_p10), 1, %s915_s19   ;;  %p1193_p4 = scmp.ne.s32.totalorder (!%p1192_p10), %s1185_s24, 0 }
  0x4c   : > { %228 = sbr.rel (%p1192_p10) target bundleno = 582 (0x246), region = 40  ;;  %s586_s14 = sshll.u32 (!%p1192_p10), %s1081_s13, 3 }
  0x4d   : > { %s231_s16 = scalar_lea.sflag (!%p1192_p10), [#allocation3], %s1081_s13  ;;  %s1087_s17 = scalar_lea.vmem (!%p1192_p10), [#allocation2], %s586_s14 }
  0x51   : > { %898 = dma.done.wait (%p1193_p4), %s231_s16, 128  }
  0x52   : > { %900 = vsyncadd (%p1193_p4), %s231_s16, 4294967168  ;;  %p1194_p8 = scmp.eq.s32.totalorder %s984_s22, 0 }
  0x54   : > { %902 = dma.done.wait (%p1194_p8), [#allocation6], 4096   ;;  %p1195_p3 = pmov %p1194_p8 }
  0x55   : > { %v930_v0 = vmov 0.0   ;;  %vm931_vm0 = vmmov 0   ;;  %v285_v1 = vld [vmem:[#allocation5 + $0x78] sm:$0xff]  ;;  %v284_v2 = vld [vmem:[#allocation5 + $0x70] sm:$0xff]  ;;  %v283_v3 = vld [vmem:[#allocation5 + $0x68] sm:$0xff]  ;;  %s593_s11 = sshll.u32 %s984_s22, 7 }
  0x56   : > { %904 = vsyncadd (%p1195_p3), [#allocation6], 4294963200  ;;  %630 = vmatprep.subr.mxu0 %v930_v0  ;;  %662 = vmatprep.mubr.msk.f32.mxu0 %vm931_vm0, %v930_v0  ;;  %v282_v4 = vld [vmem:[#allocation5 + $0x60] sm:$0xff]  ;;  %v281_v5 = vld [vmem:[#allocation5 + $0x58] sm:$0xff]  ;;  %s268_s12 = scalar_lea.vmem [#allocation8], %s586_s14  ;;  %s487_s28 = scalar_lea.hbm %s1180_s5, %s593_s11 }
  0x57   : > { %665 = vmatprep.subr.mxu1 %v930_v0  ;;  %697 = vmatprep.mubr.msk.f32.mxu1 %vm931_vm0, %v930_v0  ;;  %v280_v6 = vld [vmem:[#allocation5 + $0x50] sm:$0xff]  ;;  %v279_v7 = vld [vmem:[#allocation5 + $0x48] sm:$0xff]  ;;  %v278_v8 = vld [vmem:[#allocation5 + $0x40] sm:$0xff]  ;;  %s489_s30 = sshll.u32 %s268_s12, 4  ;;  %s476_s7 = scalar_lea.sflag [#allocation4], %s1081_s13  ;;  %s490_s30 = int_to_ptr.vmem [resolvable:$true] %s489_s30 }
  0x58   : > { %631 = vmatpush3.msra.mxu0 %v285_v1  ;;  %v277_v9 = vld [vmem:[#allocation5 + $0x38] sm:$0xff]  ;;  %v276_v10 = vld [vmem:[#allocation5 + $0x30] sm:$0xff]  ;;  %v275_v11 = vld [vmem:[#allocation5 + $0x28] sm:$0xff]  ;;  %s855_s9 = scalar_lea.vmem %s490_s30, 128  ;;  %p1196_p0 = scmp.ne.s32.totalorder %s1190_s23, 0 }
  0x59   : > { %632 = vmatprep.subr.mxu0 %v930_v0  ;;  %v274_v12 = vld [vmem:[#allocation5 + $0x20] sm:$0xff]  ;;  %v273_v13 = vld [vmem:[#allocation5 + $0x18] sm:$0xff]  ;;  %v272_v14 = vld [vmem:[#allocation5 + $0x10] sm:$0xff]  ;;  %p856_p11 = scmp.ne.s32.totalorder %s490_s30, %s855_s9  ;;  %s932_s16 = smov [#allocation8]  }
  0x5a   : > { %633 = vmatpush3.msra.mxu0 %v284_v2  ;;  %v271_v15 = vld [vmem:[#allocation5 + $0x8] sm:$0xff]  ;;  %v270_v16 = vld [vmem:[#allocation5] sm:$0xff]  ;;  %v269_v17 = vld [vmem:[%s1087_s17] sm:$0xff]  ;;  %s859_s17 = sshll.u32 %s932_s16, 4  ;;  %s860_s17 = int_to_ptr.vmem [resolvable:$false] %s859_s17 }
  0x5b   : > { %634 = vmatprep.subr.mxu0 %v930_v0  ;;  %v387_v18 = vld [vmem:[#allocation7 + $0x78] sm:$0xff]  ;;  %v386_v19 = vld [vmem:[#allocation7 + $0x70] sm:$0xff]  ;;  %v385_v20 = vld [vmem:[#allocation7 + $0x68] sm:$0xff]  ;;  %p857_p1 = pnand %p856_p11, %p1196_p0  ;;  %s861_s22 = scalar_lea.vmem %s860_s17, 256 }
  0x5c   : > { %635 = vmatpush3.msra.mxu0 %v283_v3  ;;  %666 = vmatpush3.msra.mxu1 %v387_v18  ;;  %v384_v21 = vld [vmem:[#allocation7 + $0x60] sm:$0xff]  ;;  %v383_v22 = vld [vmem:[#allocation7 + $0x58] sm:$0xff]  ;;  %v382_v23 = vld [vmem:[#allocation7 + $0x50] sm:$0xff]  ;;  %p862_p6 = scmp.lt.s32.totalorder %s490_s30, %s860_s17  ;;  %p863_p12 = scmp.lt.s32.totalorder %s861_s22, %s855_s9 }
  0x5d   : > { %636 = vmatprep.subr.mxu0 %v930_v0  ;;  %667 = vmatprep.subr.mxu1 %v930_v0  ;;  %v381_v24 = vld [vmem:[#allocation7 + $0x48] sm:$0xff]  ;;  %v380_v25 = vld [vmem:[#allocation7 + $0x40] sm:$0xff]  ;;  %v379_v26 = vld [vmem:[#allocation7 + $0x38] sm:$0xff]  ;;  %p858_p2 = pneg %p857_p1 }
  0x5e   : > { %637 = vmatpush3.msra.mxu0 %v282_v4  ;;  %668 = vmatpush3.msra.mxu1 %v386_v19  ;;  %v378_v27 = vld [vmem:[#allocation7 + $0x30] sm:$0xff]  ;;  %v377_v28 = vld [vmem:[#allocation7 + $0x28] sm:$0xff]  ;;  %v376_v29 = vld [vmem:[#allocation7 + $0x20] sm:$0xff]  ;;  %p864_p7 = por %p863_p12, %p862_p6 }
  0x5f   : > { %638 = vmatprep.subr.mxu0 %v930_v0  ;;  %669 = vmatprep.subr.mxu1 %v930_v0  ;;  %v375_v30 = vld [vmem:[#allocation7 + $0x18] sm:$0xff]  ;;  %v374_v31 = vld [vmem:[#allocation7 + $0x10] sm:$0xff]  ;;  %v373_v32 = vld [vmem:[#allocation7 + $0x8] sm:$0xff] }
  0x60   : > { %639 = vmatpush3.msra.mxu0 %v281_v5  ;;  %670 = vmatpush3.msra.mxu1 %v385_v20  ;;  %v372_v33 = vld [vmem:[#allocation7] sm:$0xff]  ;;  %v590_v34 = vld [vmem:[%s1177_s2] ss:$0 sm:$0xff]  ;;  %p865_p9 = pnand %p864_p7, %p858_p2 }
  0x61   : > { %640 = vmatprep.subr.mxu0 %v930_v0  ;;  %671 = vmatprep.subr.mxu1 %v930_v0  ;;  %v591_v47 = vld [vmem:[%s1179_s4] ss:$0 sm:$0xff] }
  0x62   : > { %641 = vmatpush3.msra.mxu0 %v280_v6  ;;  %672 = vmatpush3.msra.mxu1 %v384_v21 }
  0x63   : > { %642 = vmatprep.subr.mxu0 %v930_v0  ;;  %673 = vmatprep.subr.mxu1 %v930_v0 }
  0x64   : > { %643 = vmatpush3.msra.mxu0 %v279_v7  ;;  %674 = vmatpush3.msra.mxu1 %v383_v22 }
  0x65   : > { %644 = vmatprep.subr.mxu0 %v930_v0  ;;  %675 = vmatprep.subr.mxu1 %v930_v0 }
  0x66   : > { %645 = vmatpush3.msra.mxu0 %v278_v8  ;;  %676 = vmatpush3.msra.mxu1 %v382_v23 }
  0x67   : > { %646 = vmatprep.subr.mxu0 %v930_v0  ;;  %677 = vmatprep.subr.mxu1 %v930_v0 }
  0x68   : > { %647 = vmatpush3.msra.mxu0 %v277_v9  ;;  %678 = vmatpush3.msra.mxu1 %v381_v24 }
  0x69   : > { %648 = vmatprep.subr.mxu0 %v930_v0  ;;  %679 = vmatprep.subr.mxu1 %v930_v0 }
  0x6a   : > { %649 = vmatpush3.msra.mxu0 %v276_v10  ;;  %680 = vmatpush3.msra.mxu1 %v380_v25 }
  0x6b   : > { %650 = vmatprep.subr.mxu0 %v930_v0  ;;  %681 = vmatprep.subr.mxu1 %v930_v0 }
  0x6c   : > { %651 = vmatpush3.msra.mxu0 %v275_v11  ;;  %682 = vmatpush3.msra.mxu1 %v379_v26 }
  0x6d   : > { %652 = vmatprep.subr.mxu0 %v930_v0  ;;  %683 = vmatprep.subr.mxu1 %v930_v0 }
  0x6e   : > { %653 = vmatpush3.msra.mxu0 %v274_v12  ;;  %684 = vmatpush3.msra.mxu1 %v378_v27 }
  0x6f   : > { %654 = vmatprep.subr.mxu0 %v930_v0  ;;  %685 = vmatprep.subr.mxu1 %v930_v0 }
  0x70   : > { %655 = vmatpush3.msra.mxu0 %v273_v13  ;;  %686 = vmatpush3.msra.mxu1 %v377_v28 }
  0x71   : > { %656 = vmatprep.subr.mxu0 %v930_v0  ;;  %687 = vmatprep.subr.mxu1 %v930_v0 }
  0x72   : > { %657 = vmatpush3.msra.mxu0 %v272_v14  ;;  %688 = vmatpush3.msra.mxu1 %v376_v29 }
  0x73   : > { %658 = vmatprep.subr.mxu0 %v930_v0  ;;  %689 = vmatprep.subr.mxu1 %v930_v0 }
  0x74   : > { %659 = vmatpush3.msra.mxu0 %v271_v15  ;;  %690 = vmatpush3.msra.mxu1 %v375_v30 }
  0x75   : > { %660 = vmatprep.subr.mxu0 %v930_v0  ;;  %691 = vmatprep.subr.mxu1 %v930_v0 }
  0x76   : > { %661 = vmatpush3.msra.mxu0 %v270_v16  ;;  %692 = vmatpush3.msra.mxu1 %v374_v31 }
  0x77   : > { %663 = vmatmul.mubr.f32.vlgmr.msra.gmra.mxu0 %v269_v17  ;;  %693 = vmatprep.subr.mxu1 %v930_v0 }
  0x78   : > { %694 = vmatpush3.msra.mxu1 %v373_v32 }
  0x79   : > { %695 = vmatprep.subr.mxu1 %v930_v0 }
  0x7a   : > { %696 = vmatpush3.msra.mxu1 %v372_v33 }
 0x137   : > { %v359_v35 = vpop.f32.mrf.mxu0 }
 0x138   : > { %v360_v36 = vadd.f32 %v590_v34, %v359_v35 }
 0x139   : > { %v664_v37 = vpop.f32.mrf.mxu0 }
 0x13a   : > { %v363_v38 = vmul.f32 %v360_v36, %v360_v36 }
 0x13c   : > { %v364_v39 = vmul.f32 %v363_v38, %v360_v36 }
 0x13e   : > { %v365_v40 = vmul.f32 0.044715, %v364_v39 }
 0x140   : > { %v366_v41 = vadd.f32 %v365_v40, %v360_v36 }
 0x142   : > { %v367_v42 = vmul.f32 0.7978846, %v366_v41 }
 0x144   : > { %771 = vtanh.f32 %v367_v42 }
 0x151   : > { %v772_v43 = vpop.eup %771 }
 0x152   : > { %v369_v44 = vadd.f32 1.0, %v772_v43 }
 0x154   : > { %v370_v45 = vmul.f32 0.5, %v369_v44 }
 0x156   : > { %v371_v46 = vmul.f32 %v370_v45, %v360_v36 }
 0x158   : > { %698 = vmatmul.mubr.f32.vlgmr.msra.gmra.mxu1 %v371_v46 }
 0x218   : > { %v461_v48 = vpop.f32.mrf.mxu1 }
 0x219   : > { %v462_v49 = vadd.f32 %v591_v47, %v461_v48 }
 0x21a   : > { %v699_v50 = vpop.f32.mrf.mxu1 }
 0x21b   : > { %v465_v51 = vmul.f32 %v462_v49, %v462_v49 }
 0x21d   : > { %v466_v52 = vmul.f32 %v465_v51, %v462_v49 }
 0x21f   : > { %v467_v53 = vmul.f32 0.044715, %v466_v52 }
 0x221   : > { %v468_v54 = vadd.f32 %v467_v53, %v462_v49 }
 0x223   : > { %v469_v55 = vmul.f32 0.7978846, %v468_v54 }
 0x225   : > { %773 = vtanh.f32 %v469_v55 }
 0x232   : > { %v774_v56 = vpop.eup %773 }
 0x233   : > { %v471_v57 = vadd.f32 1.0, %v774_v56 }
 0x235   : > { %v472_v58 = vmul.f32 0.5, %v471_v57 }
 0x237   : > { %v473_v59 = vmul.f32 %v472_v58, %v462_v49 }
 0x239   : > { %474 = vst [vmem:[%s268_s12] sm:$0xff] %v473_v59 }
 0x23a   : > { %868 = shalt.err (!%p865_p9)
}
 0x23b   : > { %s869_s14 = scalar_lea.hbm %s487_s28, 128  ;;  %s873_s26 = scalar_lea.hbm %s1180_s5, 256 }
 0x23c   : > { %p870_p13 = scmp.ne.s32.totalorder %s487_s28, %s869_s14  ;;  %p874_p4 = scmp.lt.s32.totalorder %s487_s28, %s1180_s5 }
 0x23d   : > { %p875_p8 = scmp.lt.s32.totalorder %s873_s26, %s869_s14 }
 0x23e   : > { %p871_p5 = pnand %p870_p13, %p1196_p0 }
 0x23f   : > { %p876_p3 = por %p875_p8, %p874_p4 }
 0x240   : > { %p872_p10 = pneg %p871_p5 }
 0x242   : > { %p877_p11 = pnand %p876_p3, %p872_p10 }
 0x244   : > { %880 = shalt.err (!%p877_p11)
}
 0x245   : > { %710 = dma.vmem_to_hbm [thread:$0]  (%p1196_p0), %s490_s30, 128, %s487_s28, %s476_s7  }
 0x246 PF: > { %s501_s11 = sand.u32 1, %s911_s18   ;;  %p1197_p1 = scmp.ne.s32.totalorder %s1186_s25, 0 }
 0x247   : > { %p1198_p2 = scmp.ge.s32.totalorder %s923_s21, 2  ;;  %s502_s12 = scalar_lea.sflag [#allocation4], %s501_s11 }
 0x249   : > { %p724_p6 = pnand %p1198_p2, %p1197_p1 }
 0x24b   : > { %p725_p12 = pneg %p724_p6 }
 0x24d   : > { %906 = dma.done.wait (%p725_p12), %s502_s12, 128  }
 0x24e   : > { %908 = vsyncadd (%p725_p12), %s502_s12, 4294967168  ;;  %p19_p7 = scmp.ge.s32.totalorder %s1035_s15, 4   ;;  %s1199_s18 = smov %s915_s19 }
 0x24f   : > { %s1200_s19 = smov %s919_s20  ;;  %s1201_s20 = smov %s1051_s27 }
 0x250   : > { %s1202_s21 = smov %s1035_s15  ;;  %21 = sbr.rel (!%p19_p7) target bundleno = 6 (0x6), region = 93 }
 0x255   :  { %507 = vsyncpa [#allocation3], 1 }
 0x256   :  { %509 = vsyncpa [#allocation3 + $0x1], 1 }
 0x257   :  { %510 = vsyncpa [#allocation6], 1 }
 0x258   :  { %511 = vsyncpa [#allocation4], 1 }
 0x259   :  { %513 = vsyncpa [#allocation4 + $0x1], 1 }

</bundles_post_ra>
